<compile_context>
chip_gen: v7x
topology: tpu7x:2x2x1
jax: 0.10.0
libtpu: 0.0.40
codegen_flags: <defaults>
</compile_context>

<pallas_src>
import jax
import jax.numpy as jnp
from jax.experimental import pallas as pl
from jax.experimental.pallas import tpu as pltpu

_SUBLANE = 8


# --------------------------------------------------------------------------- #
# Kernels
# --------------------------------------------------------------------------- #
def _odefunc_mlp_kernel(x_ref, w1_ref, b1_ref, w2_ref, b2_ref, w3_ref, b3_ref,
                        o_ref):
    """3-layer MLP: relu(relu(x@W1+b1)@W2+b2)@W3+b3, f32 accumulation."""
    x = x_ref[...]
    h = jnp.dot(x, w1_ref[...], preferred_element_type=jnp.float32) + b1_ref[...]
    h = jnp.maximum(h, 0.0)
    h = jnp.dot(h.astype(w2_ref.dtype), w2_ref[...],
                preferred_element_type=jnp.float32) + b2_ref[...]
    h = jnp.maximum(h, 0.0)
    y = jnp.dot(h.astype(w3_ref.dtype), w3_ref[...],
                preferred_element_type=jnp.float32) + b3_ref[...]
    o_ref[...] = y.astype(o_ref.dtype)


def _make_rk4_kernel(num_steps, dt):
    """Fused fixed-step RK4 integrator: all steps inside one kernel invocation."""
    dt = float(dt)
    half = dt * 0.5
    sixth = dt / 6.0
    num_steps = int(num_steps)

    def kernel(x_ref, w1_ref, b1_ref, w2_ref, b2_ref, w3_ref, b3_ref, o_ref):
        # Read weights from their VMEM refs inside the body (vld slots have
        # slack in this MXU-cadence-bound loop; keeps vregs for k1..k4 temps).
        def _mlp(x):
            h = jnp.dot(x.astype(w1_ref.dtype), w1_ref[...],
                        preferred_element_type=jnp.float32) + b1_ref[...]
            h = jnp.maximum(h, 0.0)
            h = jnp.dot(h.astype(w2_ref.dtype), w2_ref[...],
                        preferred_element_type=jnp.float32) + b2_ref[...]
            h = jnp.maximum(h, 0.0)
            return jnp.dot(h.astype(w3_ref.dtype), w3_ref[...],
                           preferred_element_type=jnp.float32) + b3_ref[...]

        def step(_, x):
            k1 = _mlp(x)
            k2 = _mlp(x + half * k1)
            k3 = _mlp(x + half * k2)
            k4 = _mlp(x + dt * k3)
            return x + sixth * (k1 + 2.0 * (k2 + k3) + k4)

        x0 = x_ref[...].astype(jnp.float32)  # state kept in f32
        xf = jax.lax.fori_loop(0, num_steps, step, x0, unroll=True)
        o_ref[...] = xf.astype(o_ref.dtype)

    return kernel


# --------------------------------------------------------------------------- #
# Wrappers
# --------------------------------------------------------------------------- #
def _round_up(v, m):
    return pl.cdiv(v, m) * m


def _row_tiling(n, tile_n, row_align):
    """Clamp the batch tile to a multiple of the row alignment and pad n."""
    tile_n = min(tile_n, _round_up(n, row_align))
    tile_n = max(row_align, (tile_n // row_align) * row_align)
    n_pad = _round_up(n, tile_n)
    return tile_n, n_pad


def _row_align_for(dtype):
    itemsize = jnp.dtype(dtype).itemsize
    return _SUBLANE * max(1, 4 // itemsize)   # 8 for f32, 16 for bf16


def prepare_odefunc_params(params, *, weight_dtype=jnp.float32):
    """One-time parameter prep (hoisted out of the per-call path).

    On v6e/v7x pass weight_dtype=jnp.bfloat16 to halve HBM traffic and use the
    native bf16 MXU. Biases stay f32 (added to the f32 accumulator)."""
    w1, b1, w2, b2, w3, b3 = params
    return (w1.astype(weight_dtype), b1.astype(jnp.float32),
            w2.astype(weight_dtype), b2.astype(jnp.float32),
            w3.astype(weight_dtype), b3.astype(jnp.float32))


def odefunc_forward(t, x, params, *, tile_n=4096):
    """Pallas-backed equivalent of ODEfunc.forward(t, x). `t` is unused.

    The batch axis is a 1-D grid (auto double-buffered x/out DMA); the six
    weight tensors use constant index_maps and stay VMEM-resident."""
    del t
    w1, b1, w2, b2, w3, b3 = params
    n, d_in = x.shape
    hid = w1.shape[1]
    d_out = w3.shape[1]

    compute_dtype = w1.dtype
    x_in = x.astype(compute_dtype)

    row_align = _row_align_for(compute_dtype)
    tile_n, n_pad = _row_tiling(n, tile_n, row_align)
    if n_pad != n:
        x_in = jnp.pad(x_in, ((0, n_pad - n), (0, 0)))
    grid = (n_pad // tile_n,)

    w_bytes = jnp.dtype(compute_dtype).itemsize
    flops = 2 * n_pad * (d_in * hid + hid * hid + hid * d_out)
    bytes_accessed = (n_pad * d_in * w_bytes + n_pad * d_out * 4
                      + (d_in * hid + hid * hid + hid * d_out) * w_bytes
                      + (2 * hid + d_out) * 4)

    out = pl.pallas_call(
        _odefunc_mlp_kernel,
        out_shape=jax.ShapeDtypeStruct((n_pad, d_out), jnp.float32),
        grid=grid,
        in_specs=[
            pl.BlockSpec((tile_n, d_in), lambda i: (i, 0)),   # x: tiled rows
            pl.BlockSpec(w1.shape, lambda i: (0, 0)),         # weights: resident
            pl.BlockSpec(b1.shape, lambda i: (0, 0)),
            pl.BlockSpec(w2.shape, lambda i: (0, 0)),
            pl.BlockSpec(b2.shape, lambda i: (0, 0)),
            pl.BlockSpec(w3.shape, lambda i: (0, 0)),
            pl.BlockSpec(b3.shape, lambda i: (0, 0)),
        ],
        out_specs=pl.BlockSpec((tile_n, d_out), lambda i: (i, 0)),
        compiler_params=pltpu.CompilerParams(
            dimension_semantics=("parallel",)),
        cost_estimate=pl.CostEstimate(
            flops=int(flops), transcendentals=0,
            bytes_accessed=int(bytes_accessed)),
    )(x_in, w1, b1, w2, b2, w3, b3)

    return out[:n, :].astype(x.dtype)


def odefunc_rk4_integrate(x0, params, *, dt, num_steps, tile_n=512):
    """Integrate dx/dt = ODEfunc(t, x) with fixed-step RK4, fully fused in one
    pallas_call (weights DMA'd once, all steps unrolled in-kernel)."""
    w1, b1, w2, b2, w3, b3 = params
    n, d = x0.shape
    hid = w1.shape[1]

    row_align = _row_align_for(x0.dtype)
    tile_n, n_pad = _row_tiling(n, tile_n, row_align)
    x = jnp.pad(x0, ((0, n_pad - n), (0, 0))) if n_pad != n else x0
    grid = (n_pad // tile_n,)

    w_bytes = jnp.dtype(w1.dtype).itemsize
    flops = 2 * n_pad * (d * hid + hid * hid + hid * d) * 4 * num_steps
    bytes_accessed = (n_pad * d * jnp.dtype(x0.dtype).itemsize + n_pad * d * 4
                      + (d * hid + hid * hid + hid * d) * w_bytes
                      + (2 * hid + d) * 4)

    out = pl.pallas_call(
        _make_rk4_kernel(num_steps, dt),
        out_shape=jax.ShapeDtypeStruct((n_pad, d), jnp.float32),
        grid=grid,
        in_specs=[
            pl.BlockSpec((tile_n, d), lambda i: (i, 0)),      # x0: tiled rows
            pl.BlockSpec(w1.shape, lambda i: (0, 0)),         # weights: resident
            pl.BlockSpec(b1.shape, lambda i: (0, 0)),
            pl.BlockSpec(w2.shape, lambda i: (0, 0)),
            pl.BlockSpec(b2.shape, lambda i: (0, 0)),
            pl.BlockSpec(w3.shape, lambda i: (0, 0)),
            pl.BlockSpec(b3.shape, lambda i: (0, 0)),
        ],
        out_specs=pl.BlockSpec((tile_n, d), lambda i: (i, 0)),
        compiler_params=pltpu.CompilerParams(
            dimension_semantics=("parallel",)),
        cost_estimate=pl.CostEstimate(
            flops=int(flops), transcendentals=0,
            bytes_accessed=int(bytes_accessed)),
    )(x, w1, b1, w2, b2, w3, b3)

    return out[:n, :].astype(x0.dtype)


# --------------------------------------------------------------------------- #
# Parameter init + pure-JAX references
# --------------------------------------------------------------------------- #
def init_odefunc_params(key, state_dim, action_dim, hidden_dim=32,
                        hidden_depth=2):
    """Deterministic init mimicking torch.nn.Linear default U[-1/sqrt(fan_in), .].
    Weights are pre-transposed to (in, out); biases are (1, out)."""
    assert hidden_depth == 2
    d = state_dim + action_dim
    dims = [(d, hidden_dim), (hidden_dim, hidden_dim), (hidden_dim, d)]
    params = []
    for (fan_in, fan_out) in dims:
        key, kw, kb = jax.random.split(key, 3)
        bound = 1.0 / float(fan_in) ** 0.5
        w = jax.random.uniform(kw, (fan_in, fan_out), jnp.float32, -bound, bound)
        b = jax.random.uniform(kb, (1, fan_out), jnp.float32, -bound, bound)
        params += [w, b]
    return tuple(params)


def _reference_forward(x, params):
    w1, b1, w2, b2, w3, b3 = params
    h = jnp.maximum(x @ w1 + b1, 0.0)
    h = jnp.maximum(h @ w2 + b2, 0.0)
    return h @ w3 + b3


def _reference_rk4(x0, params, dt, num_steps):
    f = lambda x: _reference_forward(x, params)

    def step(x, _):
        k1 = f(x)
        k2 = f(x + 0.5 * dt * k1)
        k3 = f(x + 0.5 * dt * k2)
        k4 = f(x + dt * k3)
        return x + (dt / 6.0) * (k1 + 2.0 * k2 + 2.0 * k3 + k4), None

    xf, _ = jax.lax.scan(step, x0, None, length=num_steps)
    return xf


# --------------------------------------------------------------------------- #
# Demo / correctness check
# --------------------------------------------------------------------------- #
if __name__ == "__main__":
    state_dim, action_dim, hidden_dim, batch = 6, 2, 32, 8
    key = jax.random.PRNGKey(0)
    key, kx = jax.random.split(key)

    params = init_odefunc_params(key, state_dim, action_dim, hidden_dim,
                                 hidden_depth=2)
    x = jax.random.normal(kx, (batch, state_dim + action_dim), jnp.float32)
    t = jnp.float32(0.0)  # unused, mirrors ODEfunc.forward signature
    ref = _reference_forward(x, params)

    # 1) Single forward, f32 weights (the nn.Module semantics, exact check).
    params_f32 = prepare_odefunc_params(params, weight_dtype=jnp.float32)
    out = jax.block_until_ready(odefunc_forward(t, x, params_f32))
    assert out.shape == (batch, state_dim + action_dim)
    assert jnp.allclose(out, ref, atol=1e-5, rtol=1e-5)

    # 2) Single forward, bf16 weights/activations (v6e/v7x HBM-traffic path),
    #    f32 accumulation — looser tolerance.
    params_bf16 = prepare_odefunc_params(params, weight_dtype=jnp.bfloat16)
    out_bf16 = jax.block_until_ready(odefunc_forward(t, x, params_bf16))
    assert out_bf16.shape == (batch, state_dim + action_dim)
    assert jnp.allclose(out_bf16, ref, atol=5e-2, rtol=5e-2)

    # 3) Fused multi-step RK4 integration (unrolled solver loop inside one
    #    kernel, f32 weights for tight checking).
    dt, num_steps = 0.05, 4
    traj = jax.block_until_ready(
        odefunc_rk4_integrate(x, params_f32, dt=dt, num_steps=num_steps))
    ref_traj = _reference_rk4(x, params, dt, num_steps)
    assert traj.shape == x.shape
    assert jnp.allclose(traj, ref_traj, atol=1e-4, rtol=1e-4)

    print("KERNEL_OK")
</pallas_src>

<mosaic_0001>
module attributes {stable_mosaic.version = 11 : i64} {
  func.func @_odefunc_mlp_kernel(%arg0: i32, %arg1: memref<8x8xf32, #tpu.memory_space<vmem>>, %arg2: memref<8x32xf32, #tpu.memory_space<vmem>>, %arg3: memref<1x32xf32, #tpu.memory_space<vmem>>, %arg4: memref<32x32xf32, #tpu.memory_space<vmem>>, %arg5: memref<1x32xf32, #tpu.memory_space<vmem>>, %arg6: memref<32x8xf32, #tpu.memory_space<vmem>>, %arg7: memref<1x8xf32, #tpu.memory_space<vmem>>, %arg8: memref<8x8xf32, #tpu.memory_space<vmem>>) attributes {dimension_semantics = [#tpu.dimension_semantics<parallel>], iteration_bounds = array<i64: 1>, scalar_prefetch = 0 : i64, scratch_operands = 0 : i64, tpu.core_type = #tpu.core_type<tc>, window_params = [{transform_indices = @transform_0, window_bounds = array<i64: 8, 8>}, {pipeline_mode = #tpu.pipeline_mode<synchronous>, transform_indices = @transform_1, window_bounds = array<i64: 8, 32>}, {pipeline_mode = #tpu.pipeline_mode<synchronous>, transform_indices = @transform_2, window_bounds = array<i64: 1, 32>}, {pipeline_mode = #tpu.pipeline_mode<synchronous>, transform_indices = @transform_3, window_bounds = array<i64: 32, 32>}, {pipeline_mode = #tpu.pipeline_mode<synchronous>, transform_indices = @transform_4, window_bounds = array<i64: 1, 32>}, {pipeline_mode = #tpu.pipeline_mode<synchronous>, transform_indices = @transform_5, window_bounds = array<i64: 32, 8>}, {pipeline_mode = #tpu.pipeline_mode<synchronous>, transform_indices = @transform_6, window_bounds = array<i64: 1, 8>}, {transform_indices = @transform_7, window_bounds = array<i64: 8, 8>}]} {
    %c0 = arith.constant 0 : index
    %c0_0 = arith.constant 0 : index
    %0 = vector.load %arg1[%c0, %c0_0] : memref<8x8xf32, #tpu.memory_space<vmem>>, vector<8x8xf32>
    %c0_1 = arith.constant 0 : index
    %c0_2 = arith.constant 0 : index
    %1 = vector.load %arg2[%c0_1, %c0_2] : memref<8x32xf32, #tpu.memory_space<vmem>>, vector<8x32xf32>
    %cst = arith.constant dense<0.000000e+00> : vector<8x32xf32>
    %2 = tpu.matmul %0, %1, %cst {dimension_numbers = #tpu.dot_dimension_numbers<[1], [0], [0], [1], [0, 0, 1, 1], [], []>} : vector<8x8xf32>, vector<8x32xf32>, vector<8x32xf32> -> vector<8x32xf32>
    %c0_3 = arith.constant 0 : index
    %c0_4 = arith.constant 0 : index
    %3 = vector.load %arg3[%c0_3, %c0_4] : memref<1x32xf32, #tpu.memory_space<vmem>>, vector<1x32xf32>
    %4 = vector.broadcast %3 : vector<1x32xf32> to vector<8x32xf32>
    %5 = arith.addf %2, %4 : vector<8x32xf32>
    %cst_5 = arith.constant 0.000000e+00 : f32
    %6 = vector.broadcast %cst_5 : f32 to vector<8x32xf32>
    %7 = arith.maximumf %5, %6 : vector<8x32xf32>
    %c0_6 = arith.constant 0 : index
    %c0_7 = arith.constant 0 : index
    %8 = vector.load %arg4[%c0_6, %c0_7] : memref<32x32xf32, #tpu.memory_space<vmem>>, vector<32x32xf32>
    %cst_8 = arith.constant dense<0.000000e+00> : vector<8x32xf32>
    %9 = tpu.matmul %7, %8, %cst_8 {dimension_numbers = #tpu.dot_dimension_numbers<[1], [0], [0], [1], [0, 0, 1, 1], [], []>} : vector<8x32xf32>, vector<32x32xf32>, vector<8x32xf32> -> vector<8x32xf32>
    %c0_9 = arith.constant 0 : index
    %c0_10 = arith.constant 0 : index
    %10 = vector.load %arg5[%c0_9, %c0_10] : memref<1x32xf32, #tpu.memory_space<vmem>>, vector<1x32xf32>
    %11 = vector.broadcast %10 : vector<1x32xf32> to vector<8x32xf32>
    %12 = arith.addf %9, %11 : vector<8x32xf32>
    %cst_11 = arith.constant 0.000000e+00 : f32
    %13 = vector.broadcast %cst_11 : f32 to vector<8x32xf32>
    %14 = arith.maximumf %12, %13 : vector<8x32xf32>
    %c0_12 = arith.constant 0 : index
    %c0_13 = arith.constant 0 : index
    %15 = vector.load %arg6[%c0_12, %c0_13] : memref<32x8xf32, #tpu.memory_space<vmem>>, vector<32x8xf32>
    %cst_14 = arith.constant dense<0.000000e+00> : vector<8x8xf32>
    %16 = tpu.matmul %14, %15, %cst_14 {dimension_numbers = #tpu.dot_dimension_numbers<[1], [0], [0], [1], [0, 0, 1, 1], [], []>} : vector<8x32xf32>, vector<32x8xf32>, vector<8x8xf32> -> vector<8x8xf32>
    %c0_15 = arith.constant 0 : index
    %c0_16 = arith.constant 0 : index
    %17 = vector.load %arg7[%c0_15, %c0_16] : memref<1x8xf32, #tpu.memory_space<vmem>>, vector<1x8xf32>
    %18 = vector.broadcast %17 : vector<1x8xf32> to vector<8x8xf32>
    %19 = arith.addf %16, %18 : vector<8x8xf32>
    %c0_17 = arith.constant 0 : index
    %c0_18 = arith.constant 0 : index
    %20 = vector.load %arg8[%c0_17, %c0_18] : memref<8x8xf32, #tpu.memory_space<vmem>>, vector<8x8xf32>
    tpu.vector_store %arg8[%c0_17, %c0_18], %19 {strides = array<i32>} : memref<8x8xf32, #tpu.memory_space<vmem>>, vector<8x8xf32>,
    return
  }
  func.func @transform_0(%arg0: i32) -> (i32, i32) {
    %c0_i32 = arith.constant 0 : i32
    %c0_i32_0 = arith.constant 0 : i32
    return %arg0, %c0_i32 : i32, i32
  }
  func.func @transform_1(%arg0: i32) -> (i32, i32) {
    %c0_i32 = arith.constant 0 : i32
    %c0_i32_0 = arith.constant 0 : i32
    %c0_i32_1 = arith.constant 0 : i32
    return %c0_i32, %c0_i32_0 : i32, i32
  }
  func.func @transform_2(%arg0: i32) -> (i32, i32) {
    %c0_i32 = arith.constant 0 : i32
    %c0_i32_0 = arith.constant 0 : i32
    %c0_i32_1 = arith.constant 0 : i32
    return %c0_i32, %c0_i32_0 : i32, i32
  }
  func.func @transform_3(%arg0: i32) -> (i32, i32) {
    %c0_i32 = arith.constant 0 : i32
    %c0_i32_0 = arith.constant 0 : i32
    %c0_i32_1 = arith.constant 0 : i32
    return %c0_i32, %c0_i32_0 : i32, i32
  }
  func.func @transform_4(%arg0: i32) -> (i32, i32) {
    %c0_i32 = arith.constant 0 : i32
    %c0_i32_0 = arith.constant 0 : i32
    %c0_i32_1 = arith.constant 0 : i32
    return %c0_i32, %c0_i32_0 : i32, i32
  }
  func.func @transform_5(%arg0: i32) -> (i32, i32) {
    %c0_i32 = arith.constant 0 : i32
    %c0_i32_0 = arith.constant 0 : i32
    %c0_i32_1 = arith.constant 0 : i32
    return %c0_i32, %c0_i32_0 : i32, i32
  }
  func.func @transform_6(%arg0: i32) -> (i32, i32) {
    %c0_i32 = arith.constant 0 : i32
    %c0_i32_0 = arith.constant 0 : i32
    %c0_i32_1 = arith.constant 0 : i32
    return %c0_i32, %c0_i32_0 : i32, i32
  }
  func.func @transform_7(%arg0: i32) -> (i32, i32) {
    %c0_i32 = arith.constant 0 : i32
    %c0_i32_0 = arith.constant 0 : i32
    return %arg0, %c0_i32 : i32, i32
  }
}

</mosaic_0001>

<bundles_post_ra>
// kernel: tpu_custom_call.1
= control target key start
LH: loop header
LB: loop body
LE: loop exit
PB: predicated region body
PF: predicated region fallthrough
CT: control target
= control target key end

     0   :  { %12 = vsyncpa [#allocation3], 0  ;;  %s526_s0 = inlined_call_operand.vmem [shape: f32[8,8], index: 0, kind: input, shape index: {}]   ;;  %s527_s1 = inlined_call_operand.hbm [shape: f32[8,32], index: 1, kind: input, shape index: {}]   ;;  %s528_s2 = inlined_call_operand.vmem [shape: f32[1,32], index: 2, kind: input, shape index: {}]   ;;  %s529_s3 = inlined_call_operand.vmem [shape: f32[32,32], index: 3, kind: input, shape index: {}]   ;;  %s530_s4 = inlined_call_operand.vmem [shape: f32[1,32], index: 4, kind: input, shape index: {}]   ;;  %s531_s5 = inlined_call_operand.vmem [shape: f32[32,8], index: 5, kind: input, shape index: {}]   ;;  %s532_s6 = inlined_call_operand.vmem [shape: f32[1,8], index: 6, kind: input, shape index: {}]   ;;  %s533_s7 = inlined_call_operand.hbm [shape: f32[8,8], index: 7, kind: output, shape index: {}]  }
   0x1   :  { %13 = vsyncpa [#allocation4], 0  ;;  %s419_s24 = smov [#allocation2]   ;;  %s371_s28 = scalar_lea.hbm %s527_s1, 128 }
   0x2   :  { %s22_s25 = sshll.u32 %s419_s24, 4  ;;  %p372_p0 = scmp.ne.s32.totalorder %s527_s1, %s371_s28  ;;  %s23_s25 = int_to_ptr.vmem [resolvable:$true] %s22_s25 }
   0x3   :  { %p375_p1 = scmp.lt.u32.totalorder %s371_s28, %s527_s1 }
   0x5   :  { %p377_p2 = pnand %p375_p1, %p372_p0 }
   0x7   :  { %380 = shalt.err (!%p377_p2)
}
   0x8   :  { %s381_s10 = scalar_lea.vmem %s23_s25, 128  ;;  %p386_p4 = scmp.lt.s32.totalorder %s23_s25, %s23_s25 }
   0x9   :  { %p382_p3 = scmp.ne.s32.totalorder %s23_s25, %s381_s10  ;;  %p387_p5 = scmp.lt.s32.totalorder %s381_s10, %s381_s10 }
   0xb   :  { %p388_p6 = por %p387_p5, %p386_p4 }
   0xd   :  { %p389_p7 = pnand %p388_p6, %p382_p3 }
   0xf   :  { %392 = shalt.err (!%p389_p7)
}
  0x10   :  { %25 = dma.hbm_to_vmem [thread:$0]  %s527_s1, 128, %s23_s25, [#allocation3]  }
  0x11   :  { %415 = dma.done.wait [#allocation3], 128  }
  0x12   :  { %416 = vsyncadd [#allocation3], 4294967168  ;;  %v420_v0 = vmov 0.0   ;;  %vm421_vm0 = vmmov 0   ;;  %v422_v1 = vmov 0.0|0.0   ;;  %vm48_vm1 = vcmask 64512  }
  0x13   :  { %327 = vmatprep.subr.mxu0 %v420_v0  ;;  %329 = vmatprep.mubr.msk.f32.mxu0 %vm421_vm0, %v420_v0  ;;  %v40_v2 = vld [vmem:[#allocation2] sm:$0xff]  ;;  %v124_v5 = vld [vmem:[%s529_s3 + $0x8] sm:$0xff]  ;;  %v125_v7 = vld [vmem:[%s529_s3 + $0x10] sm:$0xff]  ;;  %vm134_vm2 = vcmask 261120   ;;  %s423_s10 = smov [#allocation5]  }
  0x14   :  { %354 = vmatprep.subr.bf16.mxu1 %v422_v1  ;;  %340 = vmatprep.mubr.msk.f32.mxu1 %vm421_vm0, %v420_v0  ;;  %v39_v3 = vld [vmem:[%s526_s0] sm:$0xff]  ;;  %v126_v8 = vld [vmem:[%s529_s3 + $0x18] sm:$0xff]  ;;  %v210_v11 = vld [vmem:[%s531_s5 + $0x8] sm:$0xff]  ;;  %s300_s11 = sshll.u32 %s423_s10, 4  ;;  %s301_s11 = int_to_ptr.vmem [resolvable:$true] %s300_s11 }
  0x15   :  { %v123_v4 = vld [vmem:[%s529_s3] sm:$0xff]  ;;  %328 = vmatpush3.msra.mxu0 %v40_v2  ;;  %v358_v9 = vpack.c.bf16 %v126_v8, %v125_v7  ;;  %v211_v18 = vld [vmem:[%s531_s5 + $0x10] sm:$0xff]  ;;  %v212_v19 = vld [vmem:[%s531_s5 + $0x18] sm:$0xff]  ;;  %p398_p9 = scmp.lt.s32.totalorder %s301_s11, %s301_s11 }
  0x16   :  { %330 = vmatmul.mubr.msk.f32.vlgmr.msra.gmra.mrb[0].mxu0 %vm48_vm1, %v39_v3  ;;  %v355_v6 = vpack.c.bf16 %v124_v5, %v123_v4  ;;  %360 = vmatprep.subr.bf16.mxu0 %v422_v1  ;;  %v209_v10 = vld [vmem:[%s531_s5] sm:$0xff]  ;;  %v364_v20 = vpack.c.bf16 %v212_v19, %v211_v18  ;;  %s393_s5 = scalar_lea.vmem %s301_s11, 128 }
  0x17   :  { %351 = vmatprep.mubr.msk.f32.mxu0 %vm421_vm0, %v420_v0  ;;  %v361_v12 = vpack.c.bf16 %v210_v11, %v209_v10  ;;  %v309_v13 = vld [vmem:[%s528_s2] ss:$0 sm:$0xff]  ;;  %p394_p8 = scmp.ne.s32.totalorder %s301_s11, %s393_s5  ;;  %p399_p10 = scmp.lt.s32.totalorder %s393_s5, %s393_s5 }
  0x18   :  { %356 = vmatpush3.bf16.msra.mxu1 %v355_v6  ;;  %v311_v21 = vld [vmem:[%s530_s4] ss:$0 sm:$0xff] }
  0x19   :  { %357 = vmatprep.subr.bf16.mxu1 %v422_v1  ;;  %362 = vmatpush3.bf16.msra.mxu0 %v361_v12  ;;  %v313_v26 = vld [vmem:[%s532_s6] ss:$0 sm:$0xff]  ;;  %p400_p11 = por %p399_p10, %p398_p9 }
  0x1a   :  { %363 = vmatprep.subr.bf16.mxu0 %v422_v1 }
  0x1b   :  { %p401_p12 = pnand %p400_p11, %p394_p8 }
  0x1c   :  { %359 = vmatpush3.bf16.msra.mxu1 %v358_v9 }
  0x1d   :  { %365 = vmatpush3.bf16.msra.mxu0 %v364_v20 }
  0xe9   :  { %v118_v14 = vpop.f32.mrb[0].mxu0 }
  0xea   :  { %v119_v15 = vadd.f32 %v309_v13, %v118_v14  ;;  %v331_v16 = vpop.f32.mrb[1].mxu0 }
  0xec   :  { %v122_v17 = vmax.f32 %v119_v15, 0.0 }
  0xee   :  { %341 = vmatmul.mubr.msk.f32.vlgmr.msra.gmra.mrb[0].mxu1 %vm134_vm2, %v122_v17 }
 0x1c1   :  { %v204_v22 = vpop.f32.mrb[0].mxu1 }
 0x1c2   :  { %v205_v23 = vadd.f32 %v311_v21, %v204_v22  ;;  %v342_v24 = vpop.f32.mrb[1].mxu1 }
 0x1c4   :  { %v208_v25 = vmax.f32 %v205_v23, 0.0 }
 0x1c6   :  { %352 = vmatmul.mubr.msk.f32.vlgmr.msra.gmra.mrb[2].mxu0 %vm134_vm2, %v208_v25 }
 0x299   :  { %v289_v27 = vpop.f32.mrb[2].mxu0 }
 0x29a   :  { %v290_v28 = vadd.f32 %v313_v26, %v289_v27  ;;  %v353_v29 = vpop.f32.mrb[3].mxu0 }
 0x29c   :  { %293 = vst.msk [vmem:[#allocation5] sm:$0xff] %vm48_vm1, %v290_v28 }
 0x29d   :  { %404 = shalt.err (!%p401_p12)
}
 0x29e   :  { %s405_s13 = scalar_lea.hbm %s533_s7, 128 }
 0x29f   :  { %p406_p13 = scmp.ne.s32.totalorder %s533_s7, %s405_s13  ;;  %p409_p0 = scmp.lt.u32.totalorder %s405_s13, %s533_s7 }
 0x2a1   :  { %p411_p1 = pnand %p409_p0, %p406_p13 }
 0x2a3   :  { %414 = shalt.err (!%p411_p1)
}
 0x2a4   :  { %303 = dma.vmem_to_hbm [thread:$0]  %s301_s11, 128, %s533_s7, [#allocation4]  }
 0x2a5   :  { %417 = dma.done.wait [#allocation4], 128  }
 0x2a6   :  { %418 = vsyncadd [#allocation4], 4294967168 }
 0x2a7   :  { %307 = vsyncpa [#allocation3], 1 }
 0x2a8   :  { %308 = vsyncpa [#allocation4], 1 }

</bundles_post_ra>
